<compile_context>
chip_gen: v7x
topology: tpu7x:2x2x1
jax: 0.10.0
libtpu: 0.0.40
codegen_flags: <defaults>
</compile_context>

<pallas_src>
import functools

import jax
import jax.numpy as jnp
from jax import lax
from jax.experimental import pallas as pl
from jax.experimental.pallas import tpu as pltpu

# Demo sizes (module default max_len=1024 / n_model>=128 shrunk for the demo).
MAX_LEN = 64     # embedding table rows
N_MODEL = 32     # model / embedding width
SEQ = 8          # sequence length (x.shape[1])
BATCH = 2


def make_sinusoid_table(max_len: int, n_model: int) -> jnp.ndarray:
    """Replicates RelativePositionalEmbedding.reset_parameters (deterministic)."""
    pos = jnp.concatenate([
        jnp.arange(-max_len // 2, 0, dtype=jnp.float32),
        jnp.arange(max_len // 2, dtype=jnp.float32),
    ])
    k = jnp.arange(n_model, dtype=jnp.float32)
    denom = 10000.0 ** (jnp.floor(k / 2.0) * 2.0 / n_model)
    w = pos[:, None] / denom[None, :]
    even = (jnp.arange(n_model) % 2 == 0)
    return jnp.where(even[None, :], jnp.sin(w), jnp.cos(w)).astype(jnp.float32)


def _rel_pos_kernel(table_ref, out_ref, *, seq, block_q, offset):
    """table_ref: full (max_len, n_model) table, resident in VMEM.
    out_ref: one (block_q, seq, n_model) output tile of query rows."""
    i = pl.program_id(0)
    q0 = i * block_q                       # first query row of this tile

    def write_row(r):
        # out[q0 + r, j, :] = table[(j - (q0 + r)) + offset, :]
        #                   = table[offset - q0 - r : offset - q0 - r + seq, :]
        out_ref[r] = table_ref[pl.ds(offset - q0 - r, seq), :]

    if block_q <= 64:
        # Static Python loop: constant row indices, only the table-slice start
        # depends on program_id.  Simplest possible lowering; LLO sees every
        # slice/store pair of the tile.
        for r in range(block_q):
            write_row(r)
    else:
        # Large tiles: bounded trace size, still partially unrolled for the
        # LLO scheduler.
        def body(r, carry):
            write_row(r)
            return carry
        lax.fori_loop(0, block_q, body, 0, unroll=8)
    # TODO(synk): per-row slice starts are not 8-aligned; a windowed load with
    # static sub-slices would move the shifts to the XLU, but this kernel is
    # store/DMA-bound so the dynamic ref-slice (proven lowering) is kept.


def _pick_block_q(seq: int, n_model: int, max_len: int,
                  budget_bytes: int = 40 * 1024 * 1024) -> int:
    """Largest divisor of seq whose working set (table x2 pipeline buffers +
    double-buffered output tile) fits a v7x-safe VMEM budget."""
    table_bytes = max_len * n_model * 4
    for bq in range(seq, 0, -1):
        if seq % bq != 0:
            continue
        need = 2 * table_bytes + 2 * bq * seq * n_model * 4
        if need <= budget_bytes:
            return bq
    return 1


def relative_positional_embedding(x: jnp.ndarray, table: jnp.ndarray,
                                  block_q: int | None = None) -> jnp.ndarray:
    """Forward pass: uses only x.shape[1]; returns (seq, seq, n_model) float32."""
    seq = x.shape[1]
    max_len, n_model = table.shape
    offset = max_len // 2 + max_len % 2            # sum(divmod(max_len, 2))

    # All gathered indices (j - i + offset) must lie in [0, max_len): there is no
    # runtime bounds check on VMEM refs, so enforce it statically.
    assert seq <= offset + 1 and seq <= max_len - offset, (
        f"seq={seq} too large for max_len={max_len}: relative indices leave the table")

    table = table.astype(jnp.float32)

    if block_q is None:
        block_q = _pick_block_q(seq, n_model, max_len)
    assert seq % block_q == 0, (seq, block_q)
    grid = (seq // block_q,)

    table_bytes = max_len * n_model * 4
    out_block_bytes = block_q * seq * n_model * 4
    vmem_needed = 2 * table_bytes + 2 * out_block_bytes + (1 << 20)
    # At least the v5e scoped default, never above ~48 MiB (v7x has 64 MiB
    # physical VMEM per TensorCore).
    vmem_limit = int(min(max(vmem_needed, 16 * 1024 * 1024), 48 * 1024 * 1024))

    # DMA-only kernel: ~0 flops, reads the table once, writes the full output.
    cost = pl.CostEstimate(
        flops=0,
        transcendentals=0,
        bytes_accessed=table_bytes + seq * seq * n_model * 4,
    )

    kernel = functools.partial(_rel_pos_kernel, seq=seq, block_q=block_q,
                               offset=offset)

    grid_spec = pltpu.PrefetchScalarGridSpec(
        num_scalar_prefetch=0,
        grid=grid,
        in_specs=[
            # Full table, constant block index -> fetched once, stays resident.
            pl.BlockSpec((max_len, n_model), lambda i: (0, 0)),
        ],
        # One tile of block_q query rows per grid step.
        out_specs=pl.BlockSpec((block_q, seq, n_model), lambda i: (i, 0, 0)),
    )

    return pl.pallas_call(
        kernel,
        out_shape=jax.ShapeDtypeStruct((seq, seq, n_model), jnp.float32),
        grid_spec=grid_spec,
        compiler_params=pltpu.CompilerParams(
            # Disjoint, stateless output tiles -> shardable across v7x's 2 TCs.
            dimension_semantics=("parallel",),
            vmem_limit_bytes=vmem_limit,
        ),
        cost_estimate=cost,
    )(table)


def _reference(x: jnp.ndarray, table: jnp.ndarray) -> jnp.ndarray:
    """Pure-JAX reference matching the PyTorch forward exactly."""
    seq = x.shape[1]
    max_len = table.shape[0]
    pos = jnp.arange(seq)
    offset = max_len // 2 + max_len % 2
    idx = pos[None, :] - pos[:, None] + offset      # idx[i, j] = j - i + offset
    return table[idx]


if __name__ == "__main__":
    key = jax.random.PRNGKey(0)
    # x only contributes its seq axis (x.shape[1]) to the forward pass.
    x = jax.random.normal(key, (BATCH, SEQ, N_MODEL), dtype=jnp.float32)

    table = make_sinusoid_table(MAX_LEN, N_MODEL)

    out = relative_positional_embedding(x, table)
    out = jax.block_until_ready(out)

    ref = _reference(x, table)
    assert out.shape == (SEQ, SEQ, N_MODEL), out.shape
    assert out.dtype == jnp.float32
    assert jnp.allclose(out, ref, atol=1e-6), "mismatch vs reference"

    print("KERNEL_OK")
</pallas_src>

<mosaic_0001>
module attributes {stable_mosaic.version = 11 : i64} {
  func.func @_rel_pos_kernel(%arg0: i32, %arg1: memref<64x32xf32, #tpu.memory_space<vmem>>, %arg2: memref<8x8x32xf32, #tpu.memory_space<vmem>>) attributes {dimension_semantics = [#tpu.dimension_semantics<parallel>], iteration_bounds = array<i64: 1>, scalar_prefetch = 0 : i64, scratch_operands = 0 : i64, tpu.core_type = #tpu.core_type<tc>, window_params = [{pipeline_mode = #tpu.pipeline_mode<synchronous>, transform_indices = @transform_0, window_bounds = array<i64: 64, 32>}, {transform_indices = @transform_1, window_bounds = array<i64: 8, 8, 32>}]} {
    %c8_i32 = arith.constant 8 : i32
    %0 = arith.muli %arg0, %c8_i32 : i32
    %c32_i32 = arith.constant 32 : i32
    %1 = arith.subi %c32_i32, %0 : i32
    %c0_i32 = arith.constant 0 : i32
    %2 = arith.subi %1, %c0_i32 : i32
    %3 = arith.index_cast %2 : i32 to index
    %c0 = arith.constant 0 : index
    %4 = vector.load %arg1[%3, %c0] : memref<64x32xf32, #tpu.memory_space<vmem>>, vector<8x32xf32>
    %c0_0 = arith.constant 0 : index
    %c0_1 = arith.constant 0 : index
    %c0_2 = arith.constant 0 : index
    %5 = vector.load %arg2[%c0_0, %c0_1, %c0_2] : memref<8x8x32xf32, #tpu.memory_space<vmem>>, vector<1x8x32xf32>
    %6 = vector.shape_cast %5 : vector<1x8x32xf32> to vector<8x32xf32>
    %7 = vector.shape_cast %4 : vector<8x32xf32> to vector<1x8x32xf32>
    tpu.vector_store %arg2[%c0_0, %c0_1, %c0_2], %7 {strides = array<i32>} : memref<8x8x32xf32, #tpu.memory_space<vmem>>, vector<1x8x32xf32>,
    %c32_i32_3 = arith.constant 32 : i32
    %8 = arith.subi %c32_i32_3, %0 : i32
    %c1_i32 = arith.constant 1 : i32
    %9 = arith.subi %8, %c1_i32 : i32
    %10 = arith.index_cast %9 : i32 to index
    %c0_4 = arith.constant 0 : index
    %11 = vector.load %arg1[%10, %c0_4] : memref<64x32xf32, #tpu.memory_space<vmem>>, vector<8x32xf32>
    %c1 = arith.constant 1 : index
    %c0_5 = arith.constant 0 : index
    %c0_6 = arith.constant 0 : index
    %12 = vector.load %arg2[%c1, %c0_5, %c0_6] : memref<8x8x32xf32, #tpu.memory_space<vmem>>, vector<1x8x32xf32>
    %13 = vector.shape_cast %12 : vector<1x8x32xf32> to vector<8x32xf32>
    %14 = vector.shape_cast %11 : vector<8x32xf32> to vector<1x8x32xf32>
    tpu.vector_store %arg2[%c1, %c0_5, %c0_6], %14 {strides = array<i32>} : memref<8x8x32xf32, #tpu.memory_space<vmem>>, vector<1x8x32xf32>,
    %c32_i32_7 = arith.constant 32 : i32
    %15 = arith.subi %c32_i32_7, %0 : i32
    %c2_i32 = arith.constant 2 : i32
    %16 = arith.subi %15, %c2_i32 : i32
    %17 = arith.index_cast %16 : i32 to index
    %c0_8 = arith.constant 0 : index
    %18 = vector.load %arg1[%17, %c0_8] : memref<64x32xf32, #tpu.memory_space<vmem>>, vector<8x32xf32>
    %c2 = arith.constant 2 : index
    %c0_9 = arith.constant 0 : index
    %c0_10 = arith.constant 0 : index
    %19 = vector.load %arg2[%c2, %c0_9, %c0_10] : memref<8x8x32xf32, #tpu.memory_space<vmem>>, vector<1x8x32xf32>
    %20 = vector.shape_cast %19 : vector<1x8x32xf32> to vector<8x32xf32>
    %21 = vector.shape_cast %18 : vector<8x32xf32> to vector<1x8x32xf32>
    tpu.vector_store %arg2[%c2, %c0_9, %c0_10], %21 {strides = array<i32>} : memref<8x8x32xf32, #tpu.memory_space<vmem>>, vector<1x8x32xf32>,
    %c32_i32_11 = arith.constant 32 : i32
    %22 = arith.subi %c32_i32_11, %0 : i32
    %c3_i32 = arith.constant 3 : i32
    %23 = arith.subi %22, %c3_i32 : i32
    %24 = arith.index_cast %23 : i32 to index
    %c0_12 = arith.constant 0 : index
    %25 = vector.load %arg1[%24, %c0_12] : memref<64x32xf32, #tpu.memory_space<vmem>>, vector<8x32xf32>
    %c3 = arith.constant 3 : index
    %c0_13 = arith.constant 0 : index
    %c0_14 = arith.constant 0 : index
    %26 = vector.load %arg2[%c3, %c0_13, %c0_14] : memref<8x8x32xf32, #tpu.memory_space<vmem>>, vector<1x8x32xf32>
    %27 = vector.shape_cast %26 : vector<1x8x32xf32> to vector<8x32xf32>
    %28 = vector.shape_cast %25 : vector<8x32xf32> to vector<1x8x32xf32>
    tpu.vector_store %arg2[%c3, %c0_13, %c0_14], %28 {strides = array<i32>} : memref<8x8x32xf32, #tpu.memory_space<vmem>>, vector<1x8x32xf32>,
    %c32_i32_15 = arith.constant 32 : i32
    %29 = arith.subi %c32_i32_15, %0 : i32
    %c4_i32 = arith.constant 4 : i32
    %30 = arith.subi %29, %c4_i32 : i32
    %31 = arith.index_cast %30 : i32 to index
    %c0_16 = arith.constant 0 : index
    %32 = vector.load %arg1[%31, %c0_16] : memref<64x32xf32, #tpu.memory_space<vmem>>, vector<8x32xf32>
    %c4 = arith.constant 4 : index
    %c0_17 = arith.constant 0 : index
    %c0_18 = arith.constant 0 : index
    %33 = vector.load %arg2[%c4, %c0_17, %c0_18] : memref<8x8x32xf32, #tpu.memory_space<vmem>>, vector<1x8x32xf32>
    %34 = vector.shape_cast %33 : vector<1x8x32xf32> to vector<8x32xf32>
    %35 = vector.shape_cast %32 : vector<8x32xf32> to vector<1x8x32xf32>
    tpu.vector_store %arg2[%c4, %c0_17, %c0_18], %35 {strides = array<i32>} : memref<8x8x32xf32, #tpu.memory_space<vmem>>, vector<1x8x32xf32>,
    %c32_i32_19 = arith.constant 32 : i32
    %36 = arith.subi %c32_i32_19, %0 : i32
    %c5_i32 = arith.constant 5 : i32
    %37 = arith.subi %36, %c5_i32 : i32
    %38 = arith.index_cast %37 : i32 to index
    %c0_20 = arith.constant 0 : index
    %39 = vector.load %arg1[%38, %c0_20] : memref<64x32xf32, #tpu.memory_space<vmem>>, vector<8x32xf32>
    %c5 = arith.constant 5 : index
    %c0_21 = arith.constant 0 : index
    %c0_22 = arith.constant 0 : index
    %40 = vector.load %arg2[%c5, %c0_21, %c0_22] : memref<8x8x32xf32, #tpu.memory_space<vmem>>, vector<1x8x32xf32>
    %41 = vector.shape_cast %40 : vector<1x8x32xf32> to vector<8x32xf32>
    %42 = vector.shape_cast %39 : vector<8x32xf32> to vector<1x8x32xf32>
    tpu.vector_store %arg2[%c5, %c0_21, %c0_22], %42 {strides = array<i32>} : memref<8x8x32xf32, #tpu.memory_space<vmem>>, vector<1x8x32xf32>,
    %c32_i32_23 = arith.constant 32 : i32
    %43 = arith.subi %c32_i32_23, %0 : i32
    %c6_i32 = arith.constant 6 : i32
    %44 = arith.subi %43, %c6_i32 : i32
    %45 = arith.index_cast %44 : i32 to index
    %c0_24 = arith.constant 0 : index
    %46 = vector.load %arg1[%45, %c0_24] : memref<64x32xf32, #tpu.memory_space<vmem>>, vector<8x32xf32>
    %c6 = arith.constant 6 : index
    %c0_25 = arith.constant 0 : index
    %c0_26 = arith.constant 0 : index
    %47 = vector.load %arg2[%c6, %c0_25, %c0_26] : memref<8x8x32xf32, #tpu.memory_space<vmem>>, vector<1x8x32xf32>
    %48 = vector.shape_cast %47 : vector<1x8x32xf32> to vector<8x32xf32>
    %49 = vector.shape_cast %46 : vector<8x32xf32> to vector<1x8x32xf32>
    tpu.vector_store %arg2[%c6, %c0_25, %c0_26], %49 {strides = array<i32>} : memref<8x8x32xf32, #tpu.memory_space<vmem>>, vector<1x8x32xf32>,
    %c32_i32_27 = arith.constant 32 : i32
    %50 = arith.subi %c32_i32_27, %0 : i32
    %c7_i32 = arith.constant 7 : i32
    %51 = arith.subi %50, %c7_i32 : i32
    %52 = arith.index_cast %51 : i32 to index
    %c0_28 = arith.constant 0 : index
    %53 = vector.load %arg1[%52, %c0_28] : memref<64x32xf32, #tpu.memory_space<vmem>>, vector<8x32xf32>
    %c7 = arith.constant 7 : index
    %c0_29 = arith.constant 0 : index
    %c0_30 = arith.constant 0 : index
    %54 = vector.load %arg2[%c7, %c0_29, %c0_30] : memref<8x8x32xf32, #tpu.memory_space<vmem>>, vector<1x8x32xf32>
    %55 = vector.shape_cast %54 : vector<1x8x32xf32> to vector<8x32xf32>
    %56 = vector.shape_cast %53 : vector<8x32xf32> to vector<1x8x32xf32>
    tpu.vector_store %arg2[%c7, %c0_29, %c0_30], %56 {strides = array<i32>} : memref<8x8x32xf32, #tpu.memory_space<vmem>>, vector<1x8x32xf32>,
    return
  }
  func.func @transform_0(%arg0: i32) -> (i32, i32) {
    %c0_i32 = arith.constant 0 : i32
    %c0_i32_0 = arith.constant 0 : i32
    %c0_i32_1 = arith.constant 0 : i32
    return %c0_i32, %c0_i32_0 : i32, i32
  }
  func.func @transform_1(%arg0: i32) -> (i32, i32, i32) {
    %c0_i32 = arith.constant 0 : i32
    %c0_i32_0 = arith.constant 0 : i32
    %c0_i32_1 = arith.constant 0 : i32
    return %arg0, %c0_i32, %c0_i32_0 : i32, i32, i32
  }
}

</mosaic_0001>

<bundles_post_ra>
// kernel: tpu_custom_call.1
= control target key start
LH: loop header
LB: loop body
LE: loop exit
PB: predicated region body
PF: predicated region fallthrough
CT: control target
= control target key end

     0   :  { %vm13_vm0 = vcmask 261120   ;;  %s109_s18 = smov [#allocation2]   ;;  %s166_s0 = inlined_call_operand.vmem [shape: f32[64,32], index: 0, kind: input, shape index: {}]   ;;  %s167_s1 = inlined_call_operand.hbm [shape: f32[8,8,32], index: 1, kind: output, shape index: {}]  }
   0x1   :  { %v74_v0 = vld [vmem:[%s166_s0 + $0x20] sm:$0xff]  ;;  %s55_s19 = sshll.u32 %s109_s18, 4  ;;  %s56_s19 = int_to_ptr.vmem [resolvable:$true] %s55_s19 }
   0x2   :  { %v75_v1 = vld [vmem:[%s166_s0 + $0x1f] sm:$0xff]  ;;  %14 = vst.msk [vmem:[#allocation2] sm:$0xff] %vm13_vm0, %v74_v0 }
   0x3   :  { %v76_v2 = vld [vmem:[%s166_s0 + $0x1e] sm:$0xff]  ;;  %19 = vst.msk [vmem:[#allocation2 + $0x8] sm:$0xff] %vm13_vm0, %v75_v1 }
   0x4   :  { %24 = vst.msk [vmem:[#allocation2 + $0x10] sm:$0xff] %vm13_vm0, %v76_v2  ;;  %v77_v3 = vld [vmem:[%s166_s0 + $0x1d] sm:$0xff] }
   0x5   :  { %v78_v4 = vld [vmem:[%s166_s0 + $0x1c] sm:$0xff]  ;;  %29 = vst.msk [vmem:[#allocation2 + $0x18] sm:$0xff] %vm13_vm0, %v77_v3 }
   0x6   :  { %v79_v5 = vld [vmem:[%s166_s0 + $0x1b] sm:$0xff]  ;;  %34 = vst.msk [vmem:[#allocation2 + $0x20] sm:$0xff] %vm13_vm0, %v78_v4 }
   0x7   :  { %39 = vst.msk [vmem:[#allocation2 + $0x28] sm:$0xff] %vm13_vm0, %v79_v5  ;;  %v80_v6 = vld [vmem:[%s166_s0 + $0x1a] sm:$0xff] }
   0x8   :  { %v81_v7 = vld [vmem:[%s166_s0 + $0x19] sm:$0xff] }
   0x9   :  { %6 = vsyncpa [#allocation3], 0  ;;  %44 = vst.msk [vmem:[#allocation2 + $0x30] sm:$0xff] %vm13_vm0, %v80_v6  ;;  %s85_s24 = scalar_lea.vmem %s56_s19, 1024  ;;  %p90_p1 = scmp.lt.s32.totalorder %s56_s19, %s56_s19 }
   0xa   :  { %49 = vst.msk [vmem:[#allocation2 + $0x38] sm:$0xff] %vm13_vm0, %v81_v7  ;;  %p86_p0 = scmp.ne.s32.totalorder %s56_s19, %s85_s24  ;;  %p91_p2 = scmp.lt.s32.totalorder %s85_s24, %s85_s24 }
   0xc   :  { %p92_p3 = por %p91_p2, %p90_p1 }
   0xe   :  { %p93_p4 = pnand %p92_p3, %p86_p0 }
  0x10   :  { %96 = shalt.err (!%p93_p4)
}
  0x11   :  { %s97_s27 = scalar_lea.hbm %s167_s1, 1024 }
  0x12   :  { %p98_p5 = scmp.ne.s32.totalorder %s167_s1, %s97_s27  ;;  %p101_p6 = scmp.lt.u32.totalorder %s97_s27, %s167_s1 }
  0x14   :  { %p103_p7 = pnand %p101_p6, %p98_p5 }
  0x16   :  { %106 = shalt.err (!%p103_p7)
}
  0x17   :  { %s110_s2 = smov 128   ;;  %s111_s3 = smov 8  }
  0x18   :  { %61 = dma.vmem_to_hbm [thread:$0]  %s56_s19, 1024, %s167_s1, [#allocation3], %s110_s2, %s110_s2, %s111_s3  }
  0x19   :  { %107 = dma.done.wait [#allocation3], 1024  }
  0x1a   :  { %108 = vsyncadd [#allocation3], 4294966272 }
  0x1b   :  { %65 = vsyncpa [#allocation3], 1 }

</bundles_post_ra>
